<compile_context>
chip_gen: v5e
topology: v5e:2x2
jax: 0.10.0
libtpu: 0.0.40
codegen_flags: <defaults>
</compile_context>

<pallas_src>
import math
import functools

import jax
import jax.numpy as jnp
from jax import lax
from jax.experimental import pallas as pl
from jax.experimental.pallas import tpu as pltpu


# --------------------------------------------------------------------------
# Kernel
# --------------------------------------------------------------------------
def _geglu_kernel(x_ref, wv_ref, wg_ref, bv_ref, bg_ref, o_ref, acc_v, acc_g):
    """Fused (x @ Wv, x @ Wg) accumulation + bias + exact-GELU gating."""
    k = pl.program_id(2)

    @pl.when(k == 0)
    def _():
        acc_v[...] = jnp.zeros_like(acc_v)
        acc_g[...] = jnp.zeros_like(acc_g)

    x = x_ref[...]
    acc_v[...] += jnp.dot(x, wv_ref[...], preferred_element_type=jnp.float32)
    acc_g[...] += jnp.dot(x, wg_ref[...], preferred_element_type=jnp.float32)

    @pl.when(k == pl.num_programs(2) - 1)
    def _():
        val = acc_v[...] + bv_ref[...].astype(jnp.float32)
        gate = acc_g[...] + bg_ref[...].astype(jnp.float32)
        # exact GELU (erf form) == torch.nn.functional.gelu default
        gelu = gate * 0.5 * (1.0 + lax.erf(gate * (1.0 / math.sqrt(2.0))))
        o_ref[...] = (val * gelu).astype(o_ref.dtype)


# --------------------------------------------------------------------------
# Tiling helpers (VMEM-budgeted)
# --------------------------------------------------------------------------
def _round_up(x, m):
    return ((x + m - 1) // m) * m


def _pick_divisible_tile(dim, candidates):
    for c in candidates:
        if dim >= c and dim % c == 0:
            return c
    return dim  # full extent (always legal for last-two block dims)


def _pick_m_tile(m):
    """Row tile: padding allowed, so pick the candidate minimizing waste."""
    m8 = _round_up(m, 8)
    candidates = [c for c in (512, 256, 128) if c <= m8]
    if not candidates:
        return m8
    return min(candidates, key=lambda c: (_round_up(m, c) - m, -c))


def _vmem_estimate(tm, tn, tk, itemsize):
    dbl = 2  # double-buffered pipeline buffers per BlockSpec
    in_bytes = (tm * tk + 2 * tk * tn + 2 * tn) * itemsize * dbl
    out_bytes = tm * tn * itemsize * dbl
    scratch = 2 * tm * tn * 4  # two f32 accumulators
    return in_bytes + out_bytes + scratch


def _vmem_capacity_bytes():
    try:
        return int(pltpu.get_tpu_info().vmem_capacity_bytes)
    except Exception:
        return 64 * 1024 * 1024  # conservative (v7x per-core size)


# --------------------------------------------------------------------------
# pallas_call wrapper
# --------------------------------------------------------------------------
@jax.jit
def _geglu_matmul(x2d, wv, wg, bv, bg):
    """x2d: (M, K); wv, wg: (K, N); bv, bg: (1, N).  Returns (M, N)."""
    M, K = x2d.shape
    _, N = wv.shape
    itemsize = jnp.dtype(x2d.dtype).itemsize

    # Largest tiles whose double-buffered working set fits a safe VMEM budget.
    tm = _pick_m_tile(M)
    tn = _pick_divisible_tile(N, (256, 128))
    tk = _pick_divisible_tile(K, (512, 256, 128))

    vmem_cap = _vmem_capacity_bytes()
    budget = int(vmem_cap * 0.55)  # headroom for v7x's 64 MiB VMEM
    while _vmem_estimate(tm, tn, tk, itemsize) > budget and tk > 128 and tk % 2 == 0:
        tk //= 2
    while _vmem_estimate(tm, tn, tk, itemsize) > budget and tm > 128 and tm % 2 == 0:
        tm //= 2
    while _vmem_estimate(tm, tn, tk, itemsize) > budget and tn > 128 and tn % 2 == 0:
        tn //= 2

    est = _vmem_estimate(tm, tn, tk, itemsize)
    vmem_limit = int(min(int(vmem_cap * 0.9), max(32 * 1024 * 1024, 2 * est)))

    # Pad the flattened-batch dim so any leading shape is supported.
    M_pad = _round_up(M, tm)
    if M_pad != M:
        x2d = jnp.pad(x2d, ((0, M_pad - M), (0, 0)))

    grid = (M_pad // tm, N // tn, K // tk)

    out = pl.pallas_call(
        _geglu_kernel,
        out_shape=jax.ShapeDtypeStruct((M_pad, N), x2d.dtype),
        grid_spec=pltpu.PrefetchScalarGridSpec(
            num_scalar_prefetch=0,
            grid=grid,
            in_specs=[
                pl.BlockSpec((tm, tk), lambda i, j, k: (i, k)),   # x tile
                pl.BlockSpec((tk, tn), lambda i, j, k: (k, j)),   # value weights
                pl.BlockSpec((tk, tn), lambda i, j, k: (k, j)),   # gate weights
                pl.BlockSpec((1, tn), lambda i, j, k: (0, j)),    # value bias
                pl.BlockSpec((1, tn), lambda i, j, k: (0, j)),    # gate bias
            ],
            out_specs=pl.BlockSpec((tm, tn), lambda i, j, k: (i, j)),
            scratch_shapes=[
                pltpu.VMEM((tm, tn), jnp.float32),
                pltpu.VMEM((tm, tn), jnp.float32),
            ],
        ),
        compiler_params=pltpu.CompilerParams(
            dimension_semantics=("parallel", "parallel", "arbitrary"),
            vmem_limit_bytes=vmem_limit,
        ),
    )(x2d, wv, wg, bv, bg)

    if M_pad != M:
        out = out[:M]
    return out


def geglu_forward(x, weight, bias):
    """x: (..., dim_in); weight: (2*dim_out, dim_in) [PyTorch layout]; bias: (2*dim_out,)."""
    *lead, K = x.shape
    two_n, k2 = weight.shape
    assert k2 == K
    N = two_n // 2
    M = int(math.prod(lead)) if lead else 1

    x2 = x.reshape(M, K)
    w_t = weight.T                     # (K, 2N)
    wv = w_t[:, :N]                    # first half  -> value
    wg = w_t[:, N:]                    # second half -> gate
    bv = bias[:N].reshape(1, N)
    bg = bias[N:].reshape(1, N)

    out = _geglu_matmul(x2, wv, wg, bv, bg)
    return out.reshape(*lead, N)


# --------------------------------------------------------------------------
# Module-equivalent wrapper
# --------------------------------------------------------------------------
class GEGLU:
    """JAX/Pallas port of the PyTorch GEGLU module (nn.Linear(dim_in, 2*dim_out) + GELU gate)."""

    def __init__(self, dim_in, dim_out, *, key, dtype=jnp.float32):
        self.dim_in = dim_in
        self.dim_out = dim_out
        k_w, k_b = jax.random.split(key)
        bound = 1.0 / math.sqrt(dim_in)
        # nn.Linear default init: U(-1/sqrt(fan_in), 1/sqrt(fan_in))
        # TODO(synk): exact RNG stream differs from torch (jax PRNG vs torch); forward math is identical.
        self.weight = jax.random.uniform(k_w, (dim_out * 2, dim_in), dtype, -bound, bound)
        self.bias = jax.random.uniform(k_b, (dim_out * 2,), dtype, -bound, bound)

        # Pre-transpose / split ONCE so the per-call path is just the fused kernel
        # (no wrapper-side transpose op repeated every forward).
        w_t = self.weight.T                                   # (K, 2N)
        self._wv = jnp.asarray(w_t[:, :dim_out])              # (K, N)
        self._wg = jnp.asarray(w_t[:, dim_out:])              # (K, N)
        self._bv = self.bias[:dim_out].reshape(1, dim_out)
        self._bg = self.bias[dim_out:].reshape(1, dim_out)

    def __call__(self, x):
        *lead, K = x.shape
        assert K == self.dim_in
        M = int(math.prod(lead)) if lead else 1
        out = _geglu_matmul(x.reshape(M, K), self._wv, self._wg, self._bv, self._bg)
        return out.reshape(*lead, self.dim_out)


# --------------------------------------------------------------------------
# Pure-JAX reference
# --------------------------------------------------------------------------
def geglu_ref(x, weight, bias):
    y = x @ weight.T + bias
    v, g = jnp.split(y, 2, axis=-1)
    return v * (g * 0.5 * (1.0 + lax.erf(g / jnp.sqrt(2.0).astype(g.dtype))))


if __name__ == "__main__":
    key = jax.random.PRNGKey(0)
    k_x, k_mod = jax.random.split(key)

    batch, seq, dim_in, dim_out = 2, 8, 128, 128  # lane-dense last dims (multiples of 128)
    x = jax.random.normal(k_x, (batch, seq, dim_in), dtype=jnp.float32)

    mod = GEGLU(dim_in, dim_out, key=k_mod)
    out = mod(x)
    out = jax.block_until_ready(out)

    ref = geglu_ref(x, mod.weight, mod.bias)
    assert out.shape == (batch, seq, dim_out)
    assert out.dtype == x.dtype
    assert jnp.max(jnp.abs(out - ref)) < 1e-4, float(jnp.max(jnp.abs(out - ref)))

    print("KERNEL_OK")
</pallas_src>

<mosaic_0001>
module attributes {stable_mosaic.version = 11 : i64} {
  func.func @_geglu_kernel(%arg0: i32, %arg1: i32, %arg2: i32, %arg3: memref<16x128xf32, #tpu.memory_space<vmem>>, %arg4: memref<128x128xf32, #tpu.memory_space<vmem>>, %arg5: memref<128x128xf32, #tpu.memory_space<vmem>>, %arg6: memref<1x128xf32, #tpu.memory_space<vmem>>, %arg7: memref<1x128xf32, #tpu.memory_space<vmem>>, %arg8: memref<16x128xf32, #tpu.memory_space<vmem>>, %arg9: memref<16x128xf32, #tpu.memory_space<vmem>>, %arg10: memref<16x128xf32, #tpu.memory_space<vmem>>) attributes {dimension_semantics = [#tpu.dimension_semantics<parallel>, #tpu.dimension_semantics<parallel>, #tpu.dimension_semantics<arbitrary>], iteration_bounds = array<i64: 1, 1, 1>, scalar_prefetch = 0 : i64, scratch_operands = 2 : i64, tpu.core_type = #tpu.core_type<tc>, window_params = [{transform_indices = @transform_0, window_bounds = array<i64: 16, 128>}, {transform_indices = @transform_1, window_bounds = array<i64: 128, 128>}, {transform_indices = @transform_2, window_bounds = array<i64: 128, 128>}, {transform_indices = @transform_3, window_bounds = array<i64: 1, 128>}, {transform_indices = @transform_4, window_bounds = array<i64: 1, 128>}, {transform_indices = @transform_5, window_bounds = array<i64: 16, 128>}]} {
    %c0_i32 = arith.constant 0 : i32
    %0 = arith.cmpi eq, %arg2, %c0_i32 : i32
    %1 = arith.extui %0 : i1 to i32
    %c0_i32_0 = arith.constant 0 : i32
    %2 = arith.cmpi ne, %1, %c0_i32_0 : i32
    scf.if %2 {
      %cst_17 = arith.constant 0.000000e+00 : f32
      %17 = vector.broadcast %cst_17 : f32 to vector<16x128xf32>
      %c0_18 = arith.constant 0 : index
      %c0_19 = arith.constant 0 : index
      %18 = vector.load %arg9[%c0_18, %c0_19] : memref<16x128xf32, #tpu.memory_space<vmem>>, vector<16x128xf32>
      tpu.vector_store %arg9[%c0_18, %c0_19], %17 {strides = array<i32>} : memref<16x128xf32, #tpu.memory_space<vmem>>, vector<16x128xf32>,
      %cst_20 = arith.constant 0.000000e+00 : f32
      %19 = vector.broadcast %cst_20 : f32 to vector<16x128xf32>
      %c0_21 = arith.constant 0 : index
      %c0_22 = arith.constant 0 : index
      %20 = vector.load %arg10[%c0_21, %c0_22] : memref<16x128xf32, #tpu.memory_space<vmem>>, vector<16x128xf32>
      tpu.vector_store %arg10[%c0_21, %c0_22], %19 {strides = array<i32>} : memref<16x128xf32, #tpu.memory_space<vmem>>, vector<16x128xf32>,
    } else {
    }
    %c0 = arith.constant 0 : index
    %c0_1 = arith.constant 0 : index
    %3 = vector.load %arg3[%c0, %c0_1] : memref<16x128xf32, #tpu.memory_space<vmem>>, vector<16x128xf32>
    %c0_2 = arith.constant 0 : index
    %c0_3 = arith.constant 0 : index
    %4 = vector.load %arg9[%c0_2, %c0_3] : memref<16x128xf32, #tpu.memory_space<vmem>>, vector<16x128xf32>
    %c0_4 = arith.constant 0 : index
    %c0_5 = arith.constant 0 : index
    %5 = vector.load %arg4[%c0_4, %c0_5] : memref<128x128xf32, #tpu.memory_space<vmem>>, vector<128x128xf32>
    %cst = arith.constant dense<0.000000e+00> : vector<16x128xf32>
    %6 = tpu.matmul %3, %5, %cst {dimension_numbers = #tpu.dot_dimension_numbers<[1], [0], [0], [1], [0, 0, 1, 1], [], []>} : vector<16x128xf32>, vector<128x128xf32>, vector<16x128xf32> -> vector<16x128xf32>
    %7 = arith.addf %4, %6 : vector<16x128xf32>
    %c0_6 = arith.constant 0 : index
    %c0_7 = arith.constant 0 : index
    %8 = vector.load %arg9[%c0_6, %c0_7] : memref<16x128xf32, #tpu.memory_space<vmem>>, vector<16x128xf32>
    tpu.vector_store %arg9[%c0_6, %c0_7], %7 {strides = array<i32>} : memref<16x128xf32, #tpu.memory_space<vmem>>, vector<16x128xf32>,
    %c0_8 = arith.constant 0 : index
    %c0_9 = arith.constant 0 : index
    %9 = vector.load %arg10[%c0_8, %c0_9] : memref<16x128xf32, #tpu.memory_space<vmem>>, vector<16x128xf32>
    %c0_10 = arith.constant 0 : index
    %c0_11 = arith.constant 0 : index
    %10 = vector.load %arg5[%c0_10, %c0_11] : memref<128x128xf32, #tpu.memory_space<vmem>>, vector<128x128xf32>
    %cst_12 = arith.constant dense<0.000000e+00> : vector<16x128xf32>
    %11 = tpu.matmul %3, %10, %cst_12 {dimension_numbers = #tpu.dot_dimension_numbers<[1], [0], [0], [1], [0, 0, 1, 1], [], []>} : vector<16x128xf32>, vector<128x128xf32>, vector<16x128xf32> -> vector<16x128xf32>
    %12 = arith.addf %9, %11 : vector<16x128xf32>
    %c0_13 = arith.constant 0 : index
    %c0_14 = arith.constant 0 : index
    %13 = vector.load %arg10[%c0_13, %c0_14] : memref<16x128xf32, #tpu.memory_space<vmem>>, vector<16x128xf32>
    tpu.vector_store %arg10[%c0_13, %c0_14], %12 {strides = array<i32>} : memref<16x128xf32, #tpu.memory_space<vmem>>, vector<16x128xf32>,
    %c0_i32_15 = arith.constant 0 : i32
    %14 = arith.cmpi eq, %arg2, %c0_i32_15 : i32
    %15 = arith.extui %14 : i1 to i32
    %c0_i32_16 = arith.constant 0 : i32
    %16 = arith.cmpi ne, %15, %c0_i32_16 : i32
    scf.if %16 {
      %c0_17 = arith.constant 0 : index
      %c0_18 = arith.constant 0 : index
      %17 = vector.load %arg9[%c0_17, %c0_18] : memref<16x128xf32, #tpu.memory_space<vmem>>, vector<16x128xf32>
      %c0_19 = arith.constant 0 : index
      %c0_20 = arith.constant 0 : index
      %18 = vector.load %arg6[%c0_19, %c0_20] : memref<1x128xf32, #tpu.memory_space<vmem>>, vector<1x128xf32>
      %19 = vector.broadcast %18 : vector<1x128xf32> to vector<16x128xf32>
      %20 = arith.addf %17, %19 : vector<16x128xf32>
      %c0_21 = arith.constant 0 : index
      %c0_22 = arith.constant 0 : index
      %21 = vector.load %arg10[%c0_21, %c0_22] : memref<16x128xf32, #tpu.memory_space<vmem>>, vector<16x128xf32>
      %c0_23 = arith.constant 0 : index
      %c0_24 = arith.constant 0 : index
      %22 = vector.load %arg7[%c0_23, %c0_24] : memref<1x128xf32, #tpu.memory_space<vmem>>, vector<1x128xf32>
      %23 = vector.broadcast %22 : vector<1x128xf32> to vector<16x128xf32>
      %24 = arith.addf %21, %23 : vector<16x128xf32>
      %cst_25 = arith.constant 5.000000e-01 : f32
      %25 = vector.broadcast %cst_25 : f32 to vector<16x128xf32>
      %26 = arith.mulf %24, %25 : vector<16x128xf32>
      %cst_26 = arith.constant 0.707106769 : f32
      %27 = vector.broadcast %cst_26 : f32 to vector<16x128xf32>
      %28 = arith.mulf %24, %27 : vector<16x128xf32>
      %29 = math.erf %28 : vector<16x128xf32>
      %cst_27 = arith.constant 1.000000e+00 : f32
      %30 = vector.broadcast %cst_27 : f32 to vector<16x128xf32>
      %31 = arith.addf %30, %29 : vector<16x128xf32>
      %32 = arith.mulf %26, %31 : vector<16x128xf32>
      %33 = arith.mulf %20, %32 : vector<16x128xf32>
      %c0_28 = arith.constant 0 : index
      %c0_29 = arith.constant 0 : index
      %34 = vector.load %arg8[%c0_28, %c0_29] : memref<16x128xf32, #tpu.memory_space<vmem>>, vector<16x128xf32>
      tpu.vector_store %arg8[%c0_28, %c0_29], %33 {strides = array<i32>} : memref<16x128xf32, #tpu.memory_space<vmem>>, vector<16x128xf32>,
    } else {
    }
    return
  }
  func.func @transform_0(%arg0: i32, %arg1: i32, %arg2: i32) -> (i32, i32) {
    %c0_i32 = arith.constant 0 : i32
    return %arg0, %arg2 : i32, i32
  }
  func.func @transform_1(%arg0: i32, %arg1: i32, %arg2: i32) -> (i32, i32) {
    %c0_i32 = arith.constant 0 : i32
    return %arg2, %arg1 : i32, i32
  }
  func.func @transform_2(%arg0: i32, %arg1: i32, %arg2: i32) -> (i32, i32) {
    %c0_i32 = arith.constant 0 : i32
    return %arg2, %arg1 : i32, i32
  }
  func.func @transform_3(%arg0: i32, %arg1: i32, %arg2: i32) -> (i32, i32) {
    %c0_i32 = arith.constant 0 : i32
    %c0_i32_0 = arith.constant 0 : i32
    return %c0_i32, %arg1 : i32, i32
  }
  func.func @transform_4(%arg0: i32, %arg1: i32, %arg2: i32) -> (i32, i32) {
    %c0_i32 = arith.constant 0 : i32
    %c0_i32_0 = arith.constant 0 : i32
    return %c0_i32, %arg1 : i32, i32
  }
  func.func @transform_5(%arg0: i32, %arg1: i32, %arg2: i32) -> (i32, i32) {
    %c0_i32 = arith.constant 0 : i32
    return %arg0, %arg1 : i32, i32
  }
}

</mosaic_0001>

<bundles_post_ra>
// kernel: _geglu_matmul.1
= control target key start
LH: loop header
LB: loop body
LE: loop exit
PB: predicated region body
PF: predicated region fallthrough
CT: control target
= control target key end

     0   :  { %10 = vsyncpa [#allocation5], 0  ;;  %s526_s0 = inlined_call_operand.hbm [shape: f32[16,128], index: 0, kind: input, shape index: {}]   ;;  %s527_s1 = inlined_call_operand.hbm [shape: f32[128,128], index: 1, kind: input, shape index: {}]   ;;  %s528_s2 = inlined_call_operand.hbm [shape: f32[128,128], index: 2, kind: input, shape index: {}]   ;;  %s529_s3 = inlined_call_operand.vmem [shape: f32[1,128], index: 3, kind: input, shape index: {}]   ;;  %s530_s4 = inlined_call_operand.vmem [shape: f32[1,128], index: 4, kind: input, shape index: {}]   ;;  %s531_s5 = inlined_call_operand.hbm [shape: f32[16,128], index: 5, kind: output, shape index: {}]  }
   0x1   :  { %11 = vsyncpa [#allocation8], 0 }
   0x2   :  { %12 = vsyncpa [#allocation6], 0  ;;  %s30_s20 = sshll.u32 %s527_s1, 4  ;;  %s447_s21 = smov [#allocation7]   ;;  %s31_s20 = int_to_ptr.hbm [resolvable:$true] %s30_s20 }
   0x3   :  { %s32_s22 = sshll.u32 %s447_s21, 4  ;;  %s17_s25 = sshll.u32 %s526_s0, 4  ;;  %s33_s22 = int_to_ptr.vmem [resolvable:$true] %s32_s22  ;;  %s18_s25 = int_to_ptr.hbm [resolvable:$true] %s17_s25 }
   0x4   :  { %s448_s26 = smov 128   ;;  %s449_s27 = smov 8  }
   0x5   :  { %38 = dma.hbm_to_vmem [thread:$0]  %s31_s20, 2048, %s33_s22, [#allocation8], %s448_s26, %s448_s26, %s449_s27  }
   0x6   :  { %s450_s28 = smov [#allocation4]   ;;  %s43_s1 = sshll.u32 %s528_s2, 4  ;;  %s44_s1 = int_to_ptr.hbm [resolvable:$true] %s43_s1 }
   0x7   :  { %s19_s29 = sshll.u32 %s450_s28, 4  ;;  %s451_s0 = smov [#allocation9]   ;;  %s20_s29 = int_to_ptr.vmem [resolvable:$true] %s19_s29 }
   0x8   :  { %25 = dma.hbm_to_vmem [thread:$0]  %s18_s25, 256, %s20_s29, [#allocation5], %s448_s26, %s448_s26, %s449_s27  }
   0x9   :  { %s45_s7 = sshll.u32 %s451_s0, 4  ;;  %s46_s7 = int_to_ptr.vmem [resolvable:$true] %s45_s7 }
   0xa   :  { %51 = dma.hbm_to_vmem [thread:$0]  %s44_s1, 2048, %s46_s7, [#allocation8], %s448_s26, %s448_s26, %s449_s27  }
   0xb   :  { %441 = dma.done.wait [#allocation5], 256  }
   0xc   :  { %442 = vsyncadd [#allocation5], 4294967040 }
   0xd   :  { %443 = dma.done.wait [#allocation8], 4096  }
   0xe   :  { %444 = vsyncadd [#allocation8], 4294963200  ;;  %v140_v0 = vld [vmem:[#allocation9 + $0x78] sm:$0xff]  ;;  %v139_v1 = vld [vmem:[#allocation9 + $0x70] sm:$0xff]  ;;  %s285_s13 = sshll.u32 %s531_s5, 4  ;;  %s286_s13 = int_to_ptr.hbm [resolvable:$true] %s285_s13 }
   0xf   :  { %141 = vmatpush.msra.mxu1 %v140_v0  ;;  %317 = vmatpush.msra.mxu3 %v140_v0  ;;  %v138_v2 = vld [vmem:[#allocation9 + $0x68] sm:$0xff]  ;;  %v137_v3 = vld [vmem:[#allocation9 + $0x60] sm:$0xff]  ;;  %v136_v4 = vld [vmem:[#allocation9 + $0x58] sm:$0xff] }
  0x10   :  { %v95_v5 = vld [vmem:[#allocation7 + $0x78] sm:$0xff]  ;;  %v94_v6 = vld [vmem:[#allocation7 + $0x70] sm:$0xff]  ;;  %v93_v8 = vld [vmem:[#allocation7 + $0x68] sm:$0xff] }
  0x11   :  { %142 = vmatpush.msra.mxu1 %v139_v1  ;;  %318 = vmatpush.msra.mxu3 %v139_v1  ;;  %v135_v7 = vld [vmem:[#allocation9 + $0x50] sm:$0xff]  ;;  %v134_v9 = vld [vmem:[#allocation9 + $0x48] sm:$0xff]  ;;  %v92_v10 = vld [vmem:[#allocation7 + $0x60] sm:$0xff] }
  0x12   :  { %96 = vmatpush.msra.mxu0 %v95_v5  ;;  %301 = vmatpush.msra.mxu2 %v95_v5  ;;  %v133_v11 = vld [vmem:[#allocation9 + $0x40] sm:$0xff]  ;;  %v91_v12 = vld [vmem:[#allocation7 + $0x58] sm:$0xff]  ;;  %v90_v14 = vld [vmem:[#allocation7 + $0x50] sm:$0xff] }
  0x13   :  { %143 = vmatpush.msra.mxu1 %v138_v2  ;;  %319 = vmatpush.msra.mxu3 %v138_v2  ;;  %v132_v13 = vld [vmem:[#allocation9 + $0x38] sm:$0xff]  ;;  %v131_v15 = vld [vmem:[#allocation9 + $0x30] sm:$0xff]  ;;  %v89_v16 = vld [vmem:[#allocation7 + $0x48] sm:$0xff] }
  0x14   :  { %97 = vmatpush.msra.mxu0 %v94_v6  ;;  %302 = vmatpush.msra.mxu2 %v94_v6  ;;  %v130_v17 = vld [vmem:[#allocation9 + $0x28] sm:$0xff]  ;;  %v88_v18 = vld [vmem:[#allocation7 + $0x40] sm:$0xff]  ;;  %v87_v20 = vld [vmem:[#allocation7 + $0x38] sm:$0xff] }
  0x15   :  { %144 = vmatpush.msra.mxu1 %v137_v3  ;;  %320 = vmatpush.msra.mxu3 %v137_v3  ;;  %v129_v19 = vld [vmem:[#allocation9 + $0x20] sm:$0xff]  ;;  %v128_v21 = vld [vmem:[#allocation9 + $0x18] sm:$0xff]  ;;  %v86_v22 = vld [vmem:[#allocation7 + $0x30] sm:$0xff] }
  0x16   :  { %98 = vmatpush.msra.mxu0 %v93_v8  ;;  %303 = vmatpush.msra.mxu2 %v93_v8  ;;  %v127_v23 = vld [vmem:[#allocation9 + $0x10] sm:$0xff]  ;;  %v85_v24 = vld [vmem:[#allocation7 + $0x28] sm:$0xff]  ;;  %v84_v26 = vld [vmem:[#allocation7 + $0x20] sm:$0xff] }
  0x17   :  { %145 = vmatpush.msra.mxu1 %v136_v4  ;;  %321 = vmatpush.msra.mxu3 %v136_v4  ;;  %v126_v25 = vld [vmem:[#allocation9 + $0x8] sm:$0xff]  ;;  %v125_v27 = vld [vmem:[#allocation9] sm:$0xff]  ;;  %v76_v28 = vld [vmem:[#allocation4] sm:$0xff] }
  0x18   :  { %99 = vmatpush.msra.mxu0 %v92_v10  ;;  %304 = vmatpush.msra.mxu2 %v92_v10  ;;  %v77_v29 = vld [vmem:[#allocation4 + $0x8] sm:$0xff]  ;;  %v82_v31 = vld [vmem:[#allocation7 + $0x10] sm:$0xff]  ;;  %v81_v32 = vld [vmem:[#allocation7 + $0x8] sm:$0xff] }
  0x19   :  { %146 = vmatpush.msra.mxu1 %v135_v7  ;;  %322 = vmatpush.msra.mxu3 %v135_v7  ;;  %v83_v30 = vld [vmem:[#allocation7 + $0x18] sm:$0xff]  ;;  %v80_v33 = vld [vmem:[#allocation7] sm:$0xff]  ;;  %v339_v34 = vld [vmem:[%s530_s4] ss:$0 sm:$0xff] }
  0x1a   :  { %100 = vmatpush.msra.mxu0 %v91_v12  ;;  %305 = vmatpush.msra.mxu2 %v91_v12 }
  0x1b   :  { %147 = vmatpush.msra.mxu1 %v134_v9  ;;  %323 = vmatpush.msra.mxu3 %v134_v9 }
  0x1c   :  { %101 = vmatpush.msra.mxu0 %v90_v14  ;;  %306 = vmatpush.msra.mxu2 %v90_v14 }
  0x1d   :  { %148 = vmatpush.msra.mxu1 %v133_v11  ;;  %324 = vmatpush.msra.mxu3 %v133_v11 }
  0x1e   :  { %102 = vmatpush.msra.mxu0 %v89_v16  ;;  %307 = vmatpush.msra.mxu2 %v89_v16 }
  0x1f   :  { %149 = vmatpush.msra.mxu1 %v132_v13  ;;  %325 = vmatpush.msra.mxu3 %v132_v13 }
  0x20   :  { %103 = vmatpush.msra.mxu0 %v88_v18  ;;  %308 = vmatpush.msra.mxu2 %v88_v18 }
  0x21   :  { %150 = vmatpush.msra.mxu1 %v131_v15  ;;  %326 = vmatpush.msra.mxu3 %v131_v15 }
  0x22   :  { %104 = vmatpush.msra.mxu0 %v87_v20  ;;  %309 = vmatpush.msra.mxu2 %v87_v20 }
  0x23   :  { %151 = vmatpush.msra.mxu1 %v130_v17  ;;  %327 = vmatpush.msra.mxu3 %v130_v17 }
  0x24   :  { %105 = vmatpush.msra.mxu0 %v86_v22  ;;  %310 = vmatpush.msra.mxu2 %v86_v22 }
  0x25   :  { %152 = vmatpush.msra.mxu1 %v129_v19  ;;  %328 = vmatpush.msra.mxu3 %v129_v19 }
  0x26   :  { %106 = vmatpush.msra.mxu0 %v85_v24  ;;  %311 = vmatpush.msra.mxu2 %v85_v24 }
  0x27   :  { %153 = vmatpush.msra.mxu1 %v128_v21  ;;  %329 = vmatpush.msra.mxu3 %v128_v21 }
  0x28   :  { %107 = vmatpush.msra.mxu0 %v84_v26  ;;  %312 = vmatpush.msra.mxu2 %v84_v26 }
  0x29   :  { %154 = vmatpush.msra.mxu1 %v127_v23  ;;  %330 = vmatpush.msra.mxu3 %v127_v23 }
  0x2a   :  { %108 = vmatpush.msra.mxu0 %v83_v30  ;;  %313 = vmatpush.msra.mxu2 %v83_v30 }
  0x2b   :  { %155 = vmatpush.msra.mxu1 %v126_v25  ;;  %331 = vmatpush.msra.mxu3 %v126_v25 }
  0x2c   :  { %109 = vmatpush.msra.mxu0 %v82_v31  ;;  %314 = vmatpush.msra.mxu2 %v82_v31 }
  0x2d   :  { %156 = vmatpush.msra.mxu1 %v125_v27  ;;  %332 = vmatpush.msra.mxu3 %v125_v27 }
  0x2e   :  { %157 = vmatmul.f32.vlgmr.msra.gmra.mxu1 %v76_v28  ;;  %160 = vmatmul.f32.vlgmr.msra.gmra.mxu3 %v77_v29 }
  0x2f   :  { %110 = vmatpush.msra.mxu0 %v81_v32  ;;  %315 = vmatpush.msra.mxu2 %v81_v32 }
  0x31   :  { %111 = vmatpush.msra.mxu0 %v80_v33  ;;  %316 = vmatpush.msra.mxu2 %v80_v33 }
  0x32   :  { %112 = vmatmul.f32.vlgmr.msra.gmra.mxu0 %v76_v28  ;;  %115 = vmatmul.f32.vlgmr.msra.gmra.mxu2 %v77_v29 }
  0xab   :  { %v158_v35 = vpop.f32.mrf.mxu1 }
  0xac   :  { %v504_v36 = vadd.f32 %v339_v34, %v158_v35 }
  0xae   :  { %v189_v37 = vmul.f32 0.70710677, %v504_v36 }
  0xb0   :  { %v191_v38 = vmul.f32 %v189_v37, %v189_v37 }
  0xb1   :  { %v161_v39 = vpop.f32.mrf.mxu3 }
  0xb2   :  { %v192_v40 = vmin.f32 %v191_v38, 16.0  ;;  %v507_v41 = vadd.f32 %v339_v34, %v161_v39  ;;  %v340_v38 = vld [vmem:[%s529_s3] ss:$0 sm:$0xff]  ;;  %s452_s3 = smov [#allocation10]  }
  0xb3   :  { %s283_s10 = sshll.u32 %s452_s3, 4  ;;  %s284_s10 = int_to_ptr.vmem [resolvable:$true] %s283_s10 }
  0xb4   :  { %v193_v42 = vmul.f32 2.1237322e-06, %v192_v40  ;;  %v204_v43 = vmul.f32 3.8918573e-05, %v192_v40  ;;  %v510_v44 = vmul.f32 0.70710677, %v507_v41 }
  0xb6   :  { %v194_v45 = vadd.f32 0.00028619796, %v193_v42  ;;  %v205_v46 = vadd.f32 0.001143296, %v204_v43  ;;  %v231_v47 = vmul.f32 %v510_v44, %v510_v44  ;;  %v113_v43 = vpop.f32.mrf.mxu0 }
  0xb8   :  { %v195_v48 = vmul.f32 %v194_v45, %v192_v40  ;;  %v206_v49 = vmul.f32 %v205_v46, %v192_v40  ;;  %v232_v50 = vmin.f32 %v231_v47, 16.0 }
  0xba   :  { %v207_v51 = vadd.f32 0.014752088, %v206_v49  ;;  %v196_v52 = vadd.f32 0.0036580483, %v195_v48  ;;  %v233_v53 = vmul.f32 2.1237322e-06, %v232_v50  ;;  %v177_v48 = vadd.f32 %v340_v38, %v113_v43 }
  0xbb   :  { %v244_v54 = vmul.f32 3.8918573e-05, %v232_v50 }
  0xbc   :  { %v208_v55 = vmul.f32 %v207_v51, %v192_v40  ;;  %v234_v56 = vadd.f32 0.00028619796, %v233_v53  ;;  %v197_v59 = vmul.f32 %v196_v52, %v192_v40 }
  0xbd   :  { %v245_v57 = vadd.f32 0.001143296, %v244_v54 }
  0xbe   :  { %v209_v58 = vadd.f32 0.112945676, %v208_v55  ;;  %v235_v60 = vmul.f32 %v234_v56, %v232_v50  ;;  %v198_v2 = vadd.f32 0.05243302, %v197_v59  ;;  %v116_v56 = vpop.f32.mrf.mxu2 }
  0xbf   :  { %v246_v61 = vmul.f32 %v245_v57, %v232_v50  ;;  %v178_v59 = vadd.f32 %v340_v38, %v116_v56 }
  0xc0   :  { %v210_v62 = vmul.f32 %v209_v58, %v192_v40  ;;  %v236_v1 = vadd.f32 0.0036580483, %v235_v60  ;;  %v199_v8 = vmul.f32 %v198_v2, %v192_v40  ;;  %v188_v58 = vmul.f32 0.5, %v507_v41 }
  0xc1   :  { %v247_v63 = vadd.f32 0.014752088, %v246_v61 }
  0xc2   :  { %v211_v0 = vadd.f32 0.4994258, %v210_v62  ;;  %v237_v7 = vmul.f32 %v236_v1, %v232_v50  ;;  %v200_v12 = vadd.f32 0.18741608, %v199_v8 }
  0xc3   :  { %v248_v3 = vmul.f32 %v247_v63, %v232_v50 }
  0xc4   :  { %v212_v4 = vmul.f32 %v211_v0, %v192_v40  ;;  %v238_v11 = vadd.f32 0.05243302, %v237_v7  ;;  %v201_v17 = vmul.f32 %v200_v12, %v192_v40 }
  0xc5   :  { %v249_v5 = vadd.f32 0.112945676, %v248_v3 }
  0xc6   :  { %v213_v6 = vadd.f32 1.0, %v212_v4  ;;  %v239_v16 = vmul.f32 %v238_v11, %v232_v50  ;;  %v202_v22 = vadd.f32 1.1283791, %v201_v17 }
  0xc7   :  { %v250_v9 = vmul.f32 %v249_v5, %v232_v50 }
  0xc8   :  { %341 = vrcp.f32 %v213_v6  ;;  %v225_v20 = vand.u32 2147483648, %v213_v6  ;;  %v240_v21 = vadd.f32 0.18741608, %v239_v16  ;;  %v223_v24 = vand.u32 2147483647, %v213_v6 }
  0xc9   :  { %v251_v10 = vadd.f32 0.4994258, %v250_v9  ;;  %vm219_vm1 = vweird.f32 %v213_v6  ;;  %v203_v30 = vmul.f32 %v202_v22, %v189_v37  ;;  %v187_v37 = vmul.f32 0.5, %v504_v36 }
  0xca   :  { %v226_v27 = vor.u32 1.1754944e-38, %v225_v20  ;;  %v241_v28 = vmul.f32 %v240_v21, %v232_v50  ;;  %vm224_vm3 = vcmp.eq.f32.partialorder %v223_v24, 8.507059e+37 }
  0xcb   :  { %v252_v13 = vmul.f32 %v251_v10, %v232_v50 }
  0xcc   :  { %v242_v39 = vadd.f32 1.1283791, %v241_v28 }
  0xcd   :  { %v253_v14 = vadd.f32 1.0, %v252_v13 }
  0xce   :  { %v342_v15 = vpop.eup %341  ;;  %v243_v50 = vmul.f32 %v242_v39, %v510_v44 }
  0xcf   :  { %v215_v18 = vmul.f32 %v342_v15, %v213_v6  ;;  %343 = vrcp.f32 %v253_v14  ;;  %vm220_vm0 = vweird.f32 %v342_v15  ;;  %v265_v35 = vand.u32 2147483648, %v253_v14 }
  0xd0   :  { %vm221_vm2 = vmor %vm219_vm1, %vm220_vm0  ;;  %v263_v42 = vand.u32 2147483647, %v253_v14  ;;  %vm259_vm5 = vweird.f32 %v253_v14 }
  0xd1   :  { %v216_v19 = vsub.f32 1.0, %v215_v18  ;;  %v266_v47 = vor.u32 1.1754944e-38, %v265_v35 }
  0xd2   :  { %vm264_vm7 = vcmp.eq.f32.partialorder %v263_v42, 8.507059e+37 }
  0xd3   :  { %v217_v23 = vmul.f32 %v342_v15, %v216_v19 }
  0xd5   :  { %v344_v25 = vpop.eup %343  ;;  %v218_v26 = vadd.f32 %v342_v15, %v217_v23 }
  0xd6   :  { %v255_v29 = vmul.f32 %v344_v25, %v253_v14  ;;  %vm260_vm4 = vweird.f32 %v344_v25 }
  0xd7   :  { %v222_v31 = vsel %vm221_vm2, %v342_v15, %v218_v26  ;;  %vm261_vm6 = vmor %vm259_vm5, %vm260_vm4 }
  0xd8   :  { %v227_v32 = vsel %vm224_vm3, %v226_v27, %v222_v31  ;;  %v256_v33 = vsub.f32 1.0, %v255_v29 }
  0xd9   :  { %v228_v34 = vmul.f32 %v227_v32, %v203_v30 }
  0xda   :  { %v257_v40 = vmul.f32 %v344_v25, %v256_v33 }
  0xdb   :  { %v299_v45 = vclamps-f32 %v228_v34, 1.0 }
  0xdc   :  { %v258_v46 = vadd.f32 %v344_v25, %v257_v40 }
  0xdd   :  { %v271_v49 = vadd.f32 1.0, %v299_v45 }
  0xde   :  { %v262_v51 = vsel %vm261_vm6, %v344_v25, %v258_v46 }
  0xdf   :  { %v267_v52 = vsel %vm264_vm7, %v266_v47, %v262_v51  ;;  %v273_v53 = vmul.f32 %v271_v49, %v187_v37 }
  0xe0   :  { %v268_v54 = vmul.f32 %v267_v52, %v243_v50 }
  0xe1   :  { %v275_v55 = vmul.f32 %v273_v53, %v177_v48 }
  0xe2   :  { %v300_v57 = vclamps-f32 %v268_v54, 1.0 }
  0xe3   :  { %277 = vst [vmem:[#allocation10] sm:$0xff] %v275_v55 }
  0xe4   :  { %v272_v60 = vadd.f32 1.0, %v300_v57 }
  0xe6   :  { %v274_v36 = vmul.f32 %v272_v60, %v188_v58 }
  0xe8   :  { %v276_v44 = vmul.f32 %v274_v36, %v178_v59 }
  0xea   :  { %278 = vst [vmem:[#allocation10 + $0x8] sm:$0xff] %v276_v44 }
  0xeb   :  { %291 = dma.vmem_to_hbm [thread:$0]  %s284_s10, 256, %s286_s13, [#allocation6], %s448_s26, %s448_s26, %s449_s27  }
  0xec   :  { %445 = dma.done.wait [#allocation6], 256  }
  0xed   :  { %446 = vsyncadd [#allocation6], 4294967040 }
  0xee   :  { %296 = vsyncpa [#allocation5], 1 }
  0xef   :  { %297 = vsyncpa [#allocation8], 1 }
  0xf0   :  { %298 = vsyncpa [#allocation6], 1 }

</bundles_post_ra>
